<compile_context>
chip_gen: v7x
topology: tpu7x:2x2x1
jax: 0.10.0
libtpu: 0.0.40
codegen_flags: <defaults>
</compile_context>

<pallas_src>
import jax
import jax.numpy as jnp
from jax.experimental import pallas as pl
from jax.experimental.pallas import tpu as pltpu


# ----------------------------- kernel body ---------------------------------

def _make_h_swish_kernel(compute_f32):
    def _h_swish_kernel(x_ref, o_ref):
        x = x_ref[...]
        if compute_f32:
            x = x.astype(jnp.float32)
        # h_sigmoid(x) = ReLU6(x + 3) / 6 == clip(x + 3, 0, 6) * (1/6)
        hs = jnp.clip(x + 3.0, 0.0, 6.0) * (1.0 / 6.0)
        # h_swish(x) = x * h_sigmoid(x)
        o_ref[...] = (x * hs).astype(o_ref.dtype)
    return _h_swish_kernel


# --------------------------- chip / layout helpers --------------------------

_LANE_CANDIDATES = (8192, 4096, 2048, 1024, 512, 256, 128)
_MIB = 1024 * 1024


def _chip_props():
    """Returns (is_v5, is_multi_tc, vmem_capacity_bytes). Conservative fallbacks."""
    try:
        kind = jax.devices()[0].device_kind.lower()
    except Exception:
        kind = ""
    is_v5 = "v5" in kind
    # v7x has 2 TensorCores per chip (v4 megacore behaves similarly).
    is_multi_tc = ("v7" in kind) or ("7x" in kind) or ("v4" in kind)
    try:
        vmem_cap = int(pltpu.get_tpu_info().vmem_capacity_bytes)
    except Exception:
        vmem_cap = 64 * _MIB  # conservative (v7x per-TC capacity)
    return is_v5, is_multi_tc, vmem_cap


def _sublane_pack(elem_bytes):
    """Sublane packing factor: 8 for 4-byte, 16 for 2-byte, 32 for 1-byte dtypes."""
    return max(8, 32 // max(1, elem_bytes))


def _pick_lane_width(total, sub):
    """Widest lane-dense width (multiple of 128) dividing `total`.

    Prefers widths leaving at least `sub` rows; returns None if `total` is not
    a multiple of 128 (that case falls back to a fused jnp expression).
    """
    best = None
    for c in _LANE_CANDIDATES:
        if total % c == 0:
            if total // c >= sub:
                return c
            if best is None:
                best = c
    return best


def _pick_rows_per_block(rows, lanes, elem_bytes, sub, target_bytes, multi_tc):
    """Sublane-aligned row tile targeting ~target_bytes per block."""
    tr = (target_bytes // (lanes * elem_bytes)) // sub * sub
    tr = max(sub, tr)

    if tr >= rows:
        # Whole tensor fits in one block.
        if multi_tc and rows >= 2 * sub:
            # Split in two only when a second TensorCore exists to use it.
            half = -(-rows // 2)
            tr = -(-half // sub) * sub
        else:
            tr = rows  # full-extent block (always legal)
        return int(tr)

    if multi_tc:
        # Keep the grid count even so both TensorCores get equal work.
        grid = -(-rows // tr)
        if grid % 2 == 1:
            new_grid = grid + 1
            br = max(sub, (-(-rows // new_grid) // sub) * sub)
            br = -(-br // sub) * sub
            if (-(-rows // br)) % 2 == 0:
                tr = br
    return int(tr)


# ------------------------------- pallas call --------------------------------

def _h_swish_2d(x2d, rows, lanes, block_rows, vmem_limit, compute_f32, donate):
    grid = (pl.cdiv(rows, block_rows),)
    return pl.pallas_call(
        _make_h_swish_kernel(compute_f32),
        out_shape=jax.ShapeDtypeStruct((rows, lanes), x2d.dtype),
        grid_spec=pltpu.PrefetchScalarGridSpec(
            num_scalar_prefetch=0,
            grid=grid,
            in_specs=[pl.BlockSpec((block_rows, lanes), lambda i: (i, 0))],
            out_specs=pl.BlockSpec((block_rows, lanes), lambda i: (i, 0)),
        ),
        compiler_params=pltpu.CompilerParams(
            dimension_semantics=("parallel",),
            vmem_limit_bytes=int(vmem_limit),
        ),
        input_output_aliases=({0: 0} if donate else {}),
    )(x2d)


def h_swish(x, donate=False):
    """Applies h_swish elementwise. Accepts any shape (e.g. NCHW).

    Set donate=True (with a donated/consumable input) to alias the output
    buffer onto the input and halve peak HBM footprint.
    """
    orig_shape = x.shape
    total = x.size
    elem_bytes = jnp.dtype(x.dtype).itemsize
    sub = _sublane_pack(elem_bytes)

    is_v5, multi_tc, vmem_cap = _chip_props()

    # VMEM budget: ~6 MiB blocks / 48 MiB limit on small-VMEM (v7x-class)
    # chips, ~8 MiB blocks / 64 MiB limit on 128 MiB chips (v5e/v6e).
    if vmem_cap <= 64 * _MIB:
        target_tile_bytes, vmem_limit = 6 * _MIB, 48 * _MIB
    else:
        target_tile_bytes, vmem_limit = 8 * _MIB, 64 * _MIB

    # Native-dtype compute for bf16/f16 on chips with bf16 VALUs; f32 path on
    # v5e (no bf16 VPU) — for f32 inputs the upcast is a no-op either way.
    compute_f32 = is_v5 or (x.dtype == jnp.float32)

    lanes = _pick_lane_width(total, sub)
    if lanes is None or total == 0:
        # Rare path: element count not a multiple of 128 — a fused jnp
        # expression keeps HBM traffic at the read-N + write-N minimum.
        hs = jnp.clip(x + 3.0, 0.0, 6.0) * (1.0 / 6.0)
        return (x * hs).astype(x.dtype)

    # Common path: free reshape of the contiguous flat array, no padding.
    rows = total // lanes
    x2d = x.reshape(rows, lanes)
    block_rows = _pick_rows_per_block(
        rows, lanes, elem_bytes, sub, target_tile_bytes, multi_tc)
    out2d = _h_swish_2d(x2d, rows, lanes, block_rows, vmem_limit,
                        compute_f32, donate)
    return out2d.reshape(orig_shape)


if __name__ == "__main__":
    key = jax.random.PRNGKey(0)
    # NCHW input, small shape (batch=2, channels=4, spatial=16x16)
    x = jax.random.normal(key, (2, 4, 16, 16), dtype=jnp.float32) * 4.0

    out = h_swish(x)
    out = jax.block_until_ready(out)

    # Reference: PyTorch h_swish == x * ReLU6(x + 3) / 6
    ref = x * (jnp.clip(x + 3.0, 0.0, 6.0) / 6.0)
    assert out.shape == x.shape
    assert out.dtype == x.dtype
    assert jnp.max(jnp.abs(out - ref)) < 1e-5

    print("KERNEL_OK")
</pallas_src>

<mosaic_0001>
module attributes {stable_mosaic.version = 11 : i64} {
  func.func @_h_swish_kernel(%arg0: i32, %arg1: memref<8x256xf32, #tpu.memory_space<vmem>>, %arg2: memref<8x256xf32, #tpu.memory_space<vmem>>) attributes {dimension_semantics = [#tpu.dimension_semantics<parallel>], iteration_bounds = array<i64: 1>, scalar_prefetch = 0 : i64, scratch_operands = 0 : i64, tpu.core_type = #tpu.core_type<tc>, window_params = [{transform_indices = @transform_0, window_bounds = array<i64: 8, 256>}, {transform_indices = @transform_1, window_bounds = array<i64: 8, 256>}]} {
    %c0 = arith.constant 0 : index
    %c0_0 = arith.constant 0 : index
    %0 = vector.load %arg1[%c0, %c0_0] : memref<8x256xf32, #tpu.memory_space<vmem>>, vector<8x256xf32>
    %cst = arith.constant 3.000000e+00 : f32
    %1 = vector.broadcast %cst : f32 to vector<8x256xf32>
    %2 = arith.addf %0, %1 : vector<8x256xf32>
    %cst_1 = arith.constant 0.000000e+00 : f32
    %cst_2 = arith.constant 6.000000e+00 : f32
    %3 = vector.broadcast %cst_1 : f32 to vector<8x256xf32>
    %4 = arith.maximumf %3, %2 : vector<8x256xf32>
    %5 = vector.broadcast %cst_2 : f32 to vector<8x256xf32>
    %6 = arith.minimumf %5, %4 : vector<8x256xf32>
    %cst_3 = arith.constant 0.166666672 : f32
    %7 = vector.broadcast %cst_3 : f32 to vector<8x256xf32>
    %8 = arith.mulf %6, %7 : vector<8x256xf32>
    %9 = arith.mulf %0, %8 : vector<8x256xf32>
    %c0_4 = arith.constant 0 : index
    %c0_5 = arith.constant 0 : index
    %10 = vector.load %arg2[%c0_4, %c0_5] : memref<8x256xf32, #tpu.memory_space<vmem>>, vector<8x256xf32>
    tpu.vector_store %arg2[%c0_4, %c0_5], %9 {strides = array<i32>} : memref<8x256xf32, #tpu.memory_space<vmem>>, vector<8x256xf32>,
    return
  }
  func.func @transform_0(%arg0: i32) -> (i32, i32) {
    %c0_i32 = arith.constant 0 : i32
    %c0_i32_0 = arith.constant 0 : i32
    return %arg0, %c0_i32 : i32, i32
  }
  func.func @transform_1(%arg0: i32) -> (i32, i32) {
    %c0_i32 = arith.constant 0 : i32
    %c0_i32_0 = arith.constant 0 : i32
    return %arg0, %c0_i32 : i32, i32
  }
}

</mosaic_0001>

<bundles_post_ra>
// kernel: tpu_custom_call.1
= control target key start
LH: loop header
LB: loop body
LE: loop exit
PB: predicated region body
PF: predicated region fallthrough
CT: control target
= control target key end

     0   :  { %6 = vsyncpa [#allocation3], 0  ;;  %s136_s0 = inlined_call_operand.hbm [shape: f32[8,256], index: 0, kind: input, shape index: {}]   ;;  %s137_s1 = inlined_call_operand.hbm [shape: f32[8,256], index: 1, kind: output, shape index: {}]  }
   0x1   :  { %7 = vsyncpa [#allocation4], 0  ;;  %s100_s6 = smov [#allocation2]   ;;  %s52_s10 = scalar_lea.hbm %s136_s0, 256 }
   0x2   :  { %s14_s7 = sshll.u32 %s100_s6, 4  ;;  %p53_p0 = scmp.ne.s32.totalorder %s136_s0, %s52_s10  ;;  %s15_s7 = int_to_ptr.vmem [resolvable:$true] %s14_s7 }
   0x3   :  { %p56_p1 = scmp.lt.u32.totalorder %s52_s10, %s136_s0 }
   0x5   :  { %p58_p2 = pnand %p56_p1, %p53_p0 }
   0x7   :  { %61 = shalt.err (!%p58_p2)
}
   0x8   :  { %s62_s15 = scalar_lea.vmem %s15_s7, 256  ;;  %p67_p4 = scmp.lt.s32.totalorder %s15_s7, %s15_s7 }
   0x9   :  { %p63_p3 = scmp.ne.s32.totalorder %s15_s7, %s62_s15  ;;  %p68_p5 = scmp.lt.s32.totalorder %s62_s15, %s62_s15 }
   0xb   :  { %p69_p6 = por %p68_p5, %p67_p4 }
   0xd   :  { %p70_p7 = pnand %p69_p6, %p63_p3 }
   0xf   :  { %73 = shalt.err (!%p70_p7)
}
  0x10   :  { %17 = dma.hbm_to_vmem [thread:$0]  %s136_s0, 256, %s15_s7, [#allocation3]  }
  0x11   :  { %96 = dma.done.wait [#allocation3], 256  }
  0x12   :  { %97 = vsyncadd [#allocation3], 4294967040  ;;  %v21_v0 = vld [vmem:[#allocation2] sm:$0xff]  ;;  %v22_v1 = vld [vmem:[#allocation2 + $0x8] sm:$0xff]  ;;  %s101_s18 = smov [#allocation5]  }
  0x13   :  { %v23_v2 = vadd.f32 3.0, %v21_v0  ;;  %v24_v3 = vadd.f32 3.0, %v22_v1  ;;  %s41_s19 = sshll.u32 %s101_s18, 4  ;;  %s42_s19 = int_to_ptr.vmem [resolvable:$true] %s41_s19 }
  0x14   :  { %s74_s0 = scalar_lea.vmem %s42_s19, 256  ;;  %p79_p9 = scmp.lt.s32.totalorder %s42_s19, %s42_s19 }
  0x15   :  { %v25_v4 = vmax.f32 %v23_v2, 0.0  ;;  %v26_v5 = vmax.f32 %v24_v3, 0.0  ;;  %p75_p8 = scmp.ne.s32.totalorder %s42_s19, %s74_s0  ;;  %p80_p10 = scmp.lt.s32.totalorder %s74_s0, %s74_s0 }
  0x17   :  { %v27_v6 = vmin.f32 %v25_v4, 6.0  ;;  %v28_v7 = vmin.f32 %v26_v5, 6.0  ;;  %p81_p11 = por %p80_p10, %p79_p9 }
  0x19   :  { %v29_v8 = vmul.f32 0.16666667, %v27_v6  ;;  %v30_v9 = vmul.f32 0.16666667, %v28_v7  ;;  %p82_p12 = pnand %p81_p11, %p75_p8 }
  0x1b   :  { %v31_v10 = vmul.f32 %v29_v8, %v21_v0  ;;  %v32_v11 = vmul.f32 %v30_v9, %v22_v1 }
  0x1d   :  { %33 = vst [vmem:[#allocation5] sm:$0xff] %v31_v10  ;;  %34 = vst [vmem:[#allocation5 + $0x8] sm:$0xff] %v32_v11 }
  0x1e   :  { %85 = shalt.err (!%p82_p12)
}
  0x1f   :  { %s86_s22 = scalar_lea.hbm %s137_s1, 256 }
  0x20   :  { %p87_p13 = scmp.ne.s32.totalorder %s137_s1, %s86_s22  ;;  %p90_p0 = scmp.lt.u32.totalorder %s86_s22, %s137_s1 }
  0x22   :  { %p92_p1 = pnand %p90_p0, %p87_p13 }
  0x24   :  { %95 = shalt.err (!%p92_p1)
}
  0x25   :  { %44 = dma.vmem_to_hbm [thread:$0]  %s42_s19, 256, %s137_s1, [#allocation4]  }
  0x26   :  { %98 = dma.done.wait [#allocation4], 256  }
  0x27   :  { %99 = vsyncadd [#allocation4], 4294967040 }
  0x28   :  { %48 = vsyncpa [#allocation3], 1 }
  0x29   :  { %49 = vsyncpa [#allocation4], 1 }

</bundles_post_ra>
